<compile_context>
chip_gen: v7x
topology: tpu7x:2x2x1
jax: 0.10.0
libtpu: 0.0.40
codegen_flags: <defaults>
</compile_context>

<pallas_src>
import jax
import jax.numpy as jnp
from jax.experimental import pallas as pl
from jax.experimental.pallas import tpu as pltpu


_LANE_CANDIDATES = (2048, 1024, 512, 256, 128)
_TARGET_TILE_BYTES = 4 * 1024 * 1024   # ~4 MiB input tile per step
_MIN_GRID_STEPS = 8                    # keep both v7x TensorCores fed


def _steep_sigmoid_kernel(factor_ref, bias_ref, x_ref, o_ref):
    # Scalar path: fold the 0.5 of the tanh identity into factor / bias.
    f2 = 0.5 * factor_ref[0]
    b2 = 0.5 * bias_ref[0]
    # sigmoid(f*x + b) = 0.5 * tanh(0.5*(f*x + b)) + 0.5
    # -> single EUP transcendental per vreg, no exp / reciprocal / divide.
    o_ref[...] = (0.5 * jnp.tanh(f2 * x_ref[...] + b2) + 0.5).astype(o_ref.dtype)


def steep_sigmoid(x, factor, bias):
    """x: any-shape float array (e.g. NCHW); factor, bias: (1,) float32 scalars."""
    orig_shape = x.shape
    dtype = x.dtype
    n = x.size
    itemsize = jnp.dtype(dtype).itemsize
    sub = max(8, 32 // itemsize)       # sublane multiple: 8 f32, 16 bf16, 32 int8/fp8

    flat = x.reshape(-1)

    # Pick a lane width that divides n exactly -> reshape is free, no padding.
    lane = None
    for cand in _LANE_CANDIDATES:
        if n % cand == 0:
            lane = cand
            break

    padded = False
    if lane is None:
        # Awkward-size fallback: pad the tail up to one 128-lane row.
        # TODO(synk): handle the <128-element tail with a tiny separate op to
        # avoid the full-array pad/slice HBM copies for non-multiple-of-128 sizes.
        lane = 128
        total = pl.cdiv(n, lane) * lane
        flat = jnp.pad(flat, (0, total - n))
        padded = True

    n_rows = flat.size // lane
    x2d = flat.reshape(n_rows, lane)

    # Row tile: ~4 MiB worth of rows, rounded down to the sublane multiple,
    # capped so the grid keeps >= _MIN_GRID_STEPS steps on realistic sizes.
    target_rows = max(sub, _TARGET_TILE_BYTES // (lane * itemsize))
    tr = min(target_rows, max(sub, pl.cdiv(n_rows, _MIN_GRID_STEPS)))
    tr = max(sub, (tr // sub) * sub)
    if tr >= n_rows:
        tr = n_rows                    # full-extent block: always a legal tile
    grid = (pl.cdiv(n_rows, tr),)      # ragged last block handled by Pallas masking

    cost = pl.CostEstimate(flops=5 * n, transcendentals=n,
                           bytes_accessed=2 * n * itemsize)

    out2d = pl.pallas_call(
        _steep_sigmoid_kernel,
        out_shape=jax.ShapeDtypeStruct((n_rows, lane), dtype),
        grid=grid,
        in_specs=[
            pl.BlockSpec(memory_space=pltpu.MemorySpace.SMEM),   # factor (1,)
            pl.BlockSpec(memory_space=pltpu.MemorySpace.SMEM),   # bias   (1,)
            pl.BlockSpec((tr, lane), lambda i: (i, 0)),          # x tile
        ],
        out_specs=pl.BlockSpec((tr, lane), lambda i: (i, 0)),
        compiler_params=pltpu.CompilerParams(
            dimension_semantics=("parallel",),
            vmem_limit_bytes=64 << 20,
        ),
        cost_estimate=cost,
    )(factor, bias, x2d)

    out = out2d.reshape(-1)
    if padded:
        out = out[:n]
    return out.reshape(orig_shape)


def steep_sigmoid_ref(x, factor, bias):
    return jax.nn.sigmoid(factor[0] * x + bias[0])


if __name__ == "__main__":
    key = jax.random.PRNGKey(0)

    # Deterministic parameters (matches SteepSigmoid(factor=4.0, bias=-2.0)).
    factor = jnp.array([4.0], dtype=jnp.float32)
    bias = jnp.array([-2.0], dtype=jnp.float32)

    # Case 1: small NCHW input, size divisible by 128 -> zero-copy path.
    k1, k2 = jax.random.split(key)
    x1 = jax.random.normal(k1, (2, 4, 16, 16), dtype=jnp.float32)
    out1 = jax.block_until_ready(steep_sigmoid(x1, factor, bias))
    ref1 = steep_sigmoid_ref(x1, factor, bias)
    assert out1.shape == x1.shape and out1.dtype == x1.dtype
    assert jnp.allclose(out1, ref1, atol=5e-5, rtol=1e-4), "mismatch vs reference (case 1)"

    # Case 2: awkward size (not a multiple of 128) -> fallback pad path + ragged grid.
    x2 = jax.random.normal(k2, (3, 5, 7, 11), dtype=jnp.float32)
    out2 = jax.block_until_ready(steep_sigmoid(x2, factor, bias))
    ref2 = steep_sigmoid_ref(x2, factor, bias)
    assert out2.shape == x2.shape and out2.dtype == x2.dtype
    assert jnp.allclose(out2, ref2, atol=5e-5, rtol=1e-4), "mismatch vs reference (case 2)"

    print("KERNEL_OK")
</pallas_src>

<mosaic_0001>
module attributes {stable_mosaic.version = 11 : i64} {
  func.func @_steep_sigmoid_kernel(%arg0: i32, %arg1: memref<1xf32, #tpu.memory_space<smem>>, %arg2: memref<1xf32, #tpu.memory_space<smem>>, %arg3: memref<1x2048xf32, #tpu.memory_space<vmem>>, %arg4: memref<1x2048xf32, #tpu.memory_space<vmem>>) attributes {dimension_semantics = [#tpu.dimension_semantics<parallel>], iteration_bounds = array<i64: 1>, scalar_prefetch = 0 : i64, scratch_operands = 0 : i64, tpu.core_type = #tpu.core_type<tc>, window_params = [{transform_indices = @transform_0, window_bounds = array<i64: 1>}, {transform_indices = @transform_1, window_bounds = array<i64: 1>}, {transform_indices = @transform_2, window_bounds = array<i64: 1, 2048>}, {transform_indices = @transform_3, window_bounds = array<i64: 1, 2048>}]} {
    %c0 = arith.constant 0 : index
    %0 = memref.load %arg1[%c0] : memref<1xf32, #tpu.memory_space<smem>>
    %cst = arith.constant 5.000000e-01 : f32
    %1 = arith.mulf %cst, %0 : f32
    %c0_0 = arith.constant 0 : index
    %2 = memref.load %arg2[%c0_0] : memref<1xf32, #tpu.memory_space<smem>>
    %cst_1 = arith.constant 5.000000e-01 : f32
    %3 = arith.mulf %cst_1, %2 : f32
    %c0_2 = arith.constant 0 : index
    %c0_3 = arith.constant 0 : index
    %4 = vector.load %arg3[%c0_2, %c0_3] : memref<1x2048xf32, #tpu.memory_space<vmem>>, vector<1x2048xf32>
    %5 = vector.broadcast %1 : f32 to vector<1x2048xf32>
    %6 = arith.mulf %5, %4 : vector<1x2048xf32>
    %7 = vector.broadcast %3 : f32 to vector<1x2048xf32>
    %8 = arith.addf %6, %7 : vector<1x2048xf32>
    %9 = math.tanh %8 : vector<1x2048xf32>
    %cst_4 = arith.constant 5.000000e-01 : f32
    %10 = vector.broadcast %cst_4 : f32 to vector<1x2048xf32>
    %11 = arith.mulf %10, %9 : vector<1x2048xf32>
    %cst_5 = arith.constant 5.000000e-01 : f32
    %12 = vector.broadcast %cst_5 : f32 to vector<1x2048xf32>
    %13 = arith.addf %11, %12 : vector<1x2048xf32>
    %c0_6 = arith.constant 0 : index
    %c0_7 = arith.constant 0 : index
    %14 = vector.load %arg4[%c0_6, %c0_7] : memref<1x2048xf32, #tpu.memory_space<vmem>>, vector<1x2048xf32>
    tpu.vector_store %arg4[%c0_6, %c0_7], %13 {strides = array<i32>} : memref<1x2048xf32, #tpu.memory_space<vmem>>, vector<1x2048xf32>,
    return
  }
  func.func @transform_0(%arg0: i32) -> i32 {
    %c0_i32 = arith.constant 0 : i32
    %c0_i32_0 = arith.constant 0 : i32
    return %c0_i32 : i32
  }
  func.func @transform_1(%arg0: i32) -> i32 {
    %c0_i32 = arith.constant 0 : i32
    %c0_i32_0 = arith.constant 0 : i32
    return %c0_i32 : i32
  }
  func.func @transform_2(%arg0: i32) -> (i32, i32) {
    %c0_i32 = arith.constant 0 : i32
    %c0_i32_0 = arith.constant 0 : i32
    return %arg0, %c0_i32 : i32, i32
  }
  func.func @transform_3(%arg0: i32) -> (i32, i32) {
    %c0_i32 = arith.constant 0 : i32
    %c0_i32_0 = arith.constant 0 : i32
    return %arg0, %c0_i32 : i32, i32
  }
}

</mosaic_0001>

<bundles_post_ra>
// kernel: tpu_custom_call.1
= control target key start
LH: loop header
LB: loop body
LE: loop exit
PB: predicated region body
PF: predicated region fallthrough
CT: control target
= control target key end

     0   :  { %10 = vsyncpa [#allocation5], 0  ;;  %s170_s0 = inlined_call_operand.<no memory space> [shape: f32[1], index: 0, kind: input, shape index: {}]   ;;  %s171_s1 = inlined_call_operand.<no memory space> [shape: f32[1], index: 1, kind: input, shape index: {}]   ;;  %s172_s2 = inlined_call_operand.hbm [shape: f32[1,2048], index: 2, kind: input, shape index: {}]   ;;  %s173_s3 = inlined_call_operand.hbm [shape: f32[1,2048], index: 3, kind: output, shape index: {}]  }
   0x1   :  { %11 = vsyncpa [#allocation6], 0  ;;  %s118_s12 = smov [#allocation4]   ;;  %s70_s16 = scalar_lea.hbm %s172_s2, 256 }
   0x2   :  { %s22_s13 = sshll.u32 %s118_s12, 4  ;;  %p71_p0 = scmp.ne.s32.totalorder %s172_s2, %s70_s16  ;;  %s23_s13 = int_to_ptr.vmem [resolvable:$true] %s22_s13 }
   0x3   :  { %p74_p1 = scmp.lt.u32.totalorder %s70_s16, %s172_s2 }
   0x5   :  { %p76_p2 = pnand %p74_p1, %p71_p0 }
   0x7   :  { %79 = shalt.err (!%p76_p2)
}
   0x8   :  { %s80_s21 = scalar_lea.vmem %s23_s13, 256  ;;  %p85_p4 = scmp.lt.s32.totalorder %s23_s13, %s23_s13 }
   0x9   :  { %p81_p3 = scmp.ne.s32.totalorder %s23_s13, %s80_s21  ;;  %p86_p5 = scmp.lt.s32.totalorder %s80_s21, %s80_s21 }
   0xb   :  { %p87_p6 = por %p86_p5, %p85_p4 }
   0xd   :  { %p88_p7 = pnand %p87_p6, %p81_p3 }
   0xf   :  { %91 = shalt.err (!%p88_p7)
}
  0x10   :  { %25 = dma.hbm_to_vmem [thread:$0]  %s172_s2, 256, %s23_s13, [#allocation5]  }
  0x11   :  { %114 = dma.done.wait [#allocation5], 256  }
  0x12   :  { %115 = vsyncadd [#allocation5], 4294967040  ;;  %s30_s26 = smul.f32 0.5, %s170_s0  ;;  %v33_v1 = vld [vmem:[#allocation4] sm:$0xff]  ;;  %v34_v3 = vld [vmem:[#allocation4 + $0x8] sm:$0xff]  ;;  %s119_s2 = smov [#allocation7]  }
  0x13   :  { %s32_s29 = smul.f32 0.5, %s171_s1  ;;  %s55_s30 = sshll.u32 %s119_s2, 4  ;;  %s56_s30 = int_to_ptr.vmem [resolvable:$true] %s55_s30 }
  0x14   :  { %v35_v0 = vstv %s30_s26  ;;  %s92_s0 = scalar_lea.vmem %s56_s30, 256  ;;  %p97_p9 = scmp.lt.s32.totalorder %s56_s30, %s56_s30 }
  0x15   :  { %v38_v2 = vstv %s32_s29  ;;  %v36_v4 = vmul.f32 %v35_v0, %v33_v1  ;;  %v37_v5 = vmul.f32 %v35_v0, %v34_v3  ;;  %p93_p8 = scmp.ne.s32.totalorder %s56_s30, %s92_s0  ;;  %p98_p10 = scmp.lt.s32.totalorder %s92_s0, %s92_s0 }
  0x17   :  { %v39_v6 = vadd.f32 %v38_v2, %v36_v4  ;;  %v40_v7 = vadd.f32 %v38_v2, %v37_v5  ;;  %p99_p11 = por %p98_p10, %p97_p9 }
  0x19   :  { %66 = vtanh.f32 %v39_v6  ;;  %p100_p12 = pnand %p99_p11, %p93_p8 }
  0x1a   :  { %68 = vtanh.f32 %v40_v7 }
  0x23   :  { %v67_v8 = vpop.eup %66 }
  0x24   :  { %v69_v9 = vpop.eup %68  ;;  %v43_v10 = vmul.f32 0.5, %v67_v8 }
  0x25   :  { %v44_v11 = vmul.f32 0.5, %v69_v9 }
  0x26   :  { %v45_v12 = vadd.f32 0.5, %v43_v10 }
  0x27   :  { %v46_v13 = vadd.f32 0.5, %v44_v11 }
  0x28   :  { %47 = vst [vmem:[#allocation7] sm:$0xff] %v45_v12 }
  0x29   :  { %48 = vst [vmem:[#allocation7 + $0x8] sm:$0xff] %v46_v13 }
  0x2a   :  { %103 = shalt.err (!%p100_p12)
}
  0x2b   :  { %s104_s5 = scalar_lea.hbm %s173_s3, 256 }
  0x2c   :  { %p105_p13 = scmp.ne.s32.totalorder %s173_s3, %s104_s5  ;;  %p108_p0 = scmp.lt.u32.totalorder %s104_s5, %s173_s3 }
  0x2e   :  { %p110_p1 = pnand %p108_p0, %p105_p13 }
  0x30   :  { %113 = shalt.err (!%p110_p1)
}
  0x31   :  { %58 = dma.vmem_to_hbm [thread:$0]  %s56_s30, 256, %s173_s3, [#allocation6]  }
  0x32   :  { %116 = dma.done.wait [#allocation6], 256  }
  0x33   :  { %117 = vsyncadd [#allocation6], 4294967040 }
  0x34   :  { %62 = vsyncpa [#allocation5], 1 }
  0x35   :  { %63 = vsyncpa [#allocation6], 1 }

</bundles_post_ra>
